<compile_context>
chip_gen: v7x
topology: tpu7x:2x2x1
jax: 0.10.0
libtpu: 0.0.40
codegen_flags: <defaults>
</compile_context>

<pallas_src>
import functools

import jax
import jax.numpy as jnp
import numpy as np
from jax.experimental import pallas as pl
from jax.experimental.pallas import tpu as pltpu


def _round_up(x, m):
    return (x + m - 1) // m * m


def _cdiv(a, b):
    return (a + b - 1) // b


# -----------------------------------------------------------------------------
# Fused kernel: BN-folded conv (im2col matmul) + shift + ReLU -> spatial-sum
# accumulation over P tiles -> (finalize) padding correction, 1/P average,
# fc matmul.  One (batch, split) pair per outer grid point.
# -----------------------------------------------------------------------------
def _conv_pool_fc_kernel(x_ref, w_ref, shift_ref, wfc_ref, out_ref, acc_ref,
                         *, p_true, rows_per_split, inv_p):
    # NOTE: correctness relies on the P-tile axis being the innermost grid axis
    # (axis 2) so the VMEM accumulator init/finalize brackets a full reduction.
    s = pl.program_id(1)
    p = pl.program_id(2)

    @pl.when(p == 0)
    def _init():
        acc_ref[...] = jnp.zeros_like(acc_ref)

    x = x_ref[0]                                    # [TP, K_pad]   bf16
    w = w_ref[...]                                  # [K_pad, Cout] bf16
    conv = jnp.dot(x, w, preferred_element_type=jnp.float32)   # [TP, Cout] f32
    act = jnp.maximum(conv + shift_ref[...], 0.0)               # BN shift+ReLU
    acc_ref[...] += jnp.sum(act, axis=0, keepdims=True)         # [1, Cout]

    @pl.when(p == pl.num_programs(2) - 1)
    def _finalize():
        # Zero-padded patch rows contribute exactly relu(shift) each; subtract
        # their constant contribution once instead of masking every step.
        valid = jnp.clip(p_true - s * rows_per_split, 0, rows_per_split)
        n_pad = (rows_per_split - valid).astype(jnp.float32)
        pooled = (acc_ref[...] - n_pad * jnp.maximum(shift_ref[...], 0.0)) * inv_p
        res = jnp.dot(pooled, wfc_ref[...],
                      preferred_element_type=jnp.float32)       # [1, E]
        out_ref[...] = res[None, None]                          # (1, 1, 1, E)


# -----------------------------------------------------------------------------
# Glue: im2col (channel-major flattening matches PyTorch OIHW weight reshape)
# -----------------------------------------------------------------------------
def _im2col(x, kh, kw, stride):
    """NCHW -> patches [B, Ho*Wo, Cin*kh*kw] (spatial rows, K on last axis)."""
    B, C, H, W = x.shape
    Ho = (H - kh) // stride + 1
    Wo = (W - kw) // stride + 1
    cols = []
    for i in range(kh):
        for j in range(kw):
            win = x[:, :, i:i + stride * Ho:stride, j:j + stride * Wo:stride]
            cols.append(win.reshape(B, C, Ho * Wo))
    patches = jnp.stack(cols, axis=2).reshape(B, C * kh * kw, Ho * Wo)
    return patches.transpose(0, 2, 1), Ho, Wo       # [B, P, K]


# -----------------------------------------------------------------------------
# Wrapper: fold params, pad to TPU-friendly layouts, run the fused kernel.
# -----------------------------------------------------------------------------
def encoder_cnn_forward(image, params, *, stride=2, bn_eps=1e-3,
                        p_tile=2048, n_split=2):
    w_conv = params["w_conv"]                       # [Cout, Cin, kh, kw]
    gamma, beta = params["bn_gamma"], params["bn_beta"]
    mean, var = params["bn_mean"], params["bn_var"]
    w_fc, b_fc = params["w_fc"], params["b_fc"]     # [E, Cout], [E]

    Cout, Cin, kh, kw = w_conv.shape
    E = w_fc.shape[0]
    B = image.shape[0]

    # TODO(synk): im2col (one extra HBM pass for the patches) still runs in
    #             XLA; an in-kernel strided-slice conv would remove it.
    patches, Ho, Wo = _im2col(image, kh, kw, stride)    # [B, P, K]
    K = Cin * kh * kw
    P = Ho * Wo

    K_pad = _round_up(K, 16)                            # bf16 sublane packing
    # Large spatial tile (multiple of 256) to amortize grid-step overhead and
    # MXU pushes; guard the double-buffered bf16 working set (lane-padded K)
    # against v7x's 64 MiB VMEM.
    TP = max(256, min(p_tile, _round_up(P, 256)))
    while TP > 256 and 2 * TP * _round_up(K_pad, 128) * 2 > 40 * 2**20:
        TP -= 256

    tiles_total = _cdiv(P, TP)
    tiles_per_split = _cdiv(tiles_total, n_split)
    rows_per_split = TP * tiles_per_split
    P_pad = rows_per_split * n_split

    patches = jnp.pad(patches, ((0, 0), (0, P_pad - P), (0, K_pad - K)))
    patches = patches.astype(jnp.bfloat16)

    # Fold frozen BatchNorm (eval, eps=1e-3) into conv weight / shift.
    scale = gamma / jnp.sqrt(var + bn_eps)                          # [Cout]
    w_folded = (w_conv.reshape(Cout, K) * scale[:, None]).T         # [K, Cout]
    w_folded = jnp.pad(w_folded, ((0, K_pad - K), (0, 0))).astype(jnp.bfloat16)
    shift = (beta - mean * scale).reshape(1, Cout).astype(jnp.float32)

    w_fc_t = w_fc.T.astype(jnp.float32)                             # [Cout, E]

    # Scoped-VMEM budget: double-buffered patches tile + resident weights.
    tile_bytes = TP * _round_up(K_pad, 128) * 2
    weight_bytes = (K_pad * _round_up(Cout, 128) * 2
                    + _round_up(Cout, 128) * 4
                    + Cout * _round_up(E, 128) * 4)
    vmem_limit = int(min(48 * 2**20,
                         max(32 * 2**20, 4 * tile_bytes + 4 * weight_bytes)))

    out = pl.pallas_call(
        functools.partial(_conv_pool_fc_kernel, p_true=P,
                          rows_per_split=rows_per_split, inv_p=1.0 / P),
        out_shape=jax.ShapeDtypeStruct((B, n_split, 1, E), jnp.float32),
        grid_spec=pltpu.PrefetchScalarGridSpec(
            num_scalar_prefetch=0,
            grid=(B, n_split, tiles_per_split),
            in_specs=[
                pl.BlockSpec((1, TP, K_pad),
                             lambda b, s, p: (b, s * tiles_per_split + p, 0)),
                pl.BlockSpec((K_pad, Cout), lambda b, s, p: (0, 0)),
                pl.BlockSpec((1, Cout), lambda b, s, p: (0, 0)),
                pl.BlockSpec((Cout, E), lambda b, s, p: (0, 0)),
            ],
            out_specs=pl.BlockSpec((1, 1, 1, E), lambda b, s, p: (b, s, 0, 0)),
            scratch_shapes=[pltpu.VMEM((1, Cout), jnp.float32)],
        ),
        compiler_params=pltpu.CompilerParams(
            dimension_semantics=("parallel", "parallel", "arbitrary"),
            vmem_limit_bytes=vmem_limit),
    )(patches, w_folded, shift, w_fc_t)

    # Tiny wrapper-side combine of the per-split partial fc outputs + bias.
    return out.reshape(B, n_split, E).sum(axis=1) + b_fc[None, :]


# -----------------------------------------------------------------------------
# Pure-JAX reference (unfolded conv -> BN -> ReLU -> avg-pool -> fc)
# -----------------------------------------------------------------------------
def encoder_cnn_reference(image, params, *, stride=2, bn_eps=1e-3):
    w_conv = params["w_conv"]
    gamma, beta = params["bn_gamma"], params["bn_beta"]
    mean, var = params["bn_mean"], params["bn_var"]
    w_fc, b_fc = params["w_fc"], params["b_fc"]

    conv = jax.lax.conv_general_dilated(
        image, w_conv, window_strides=(stride, stride), padding="VALID",
        dimension_numbers=("NCHW", "OIHW", "NCHW"))
    scale = gamma / jnp.sqrt(var + bn_eps)
    bn = conv * scale[None, :, None, None] \
        + (beta - mean * scale)[None, :, None, None]
    act = jnp.maximum(bn, 0.0)
    pooled = act.mean(axis=(2, 3))                   # [B, Cout]
    return pooled @ w_fc.T + b_fc[None, :]


if __name__ == "__main__":
    key = jax.random.PRNGKey(0)
    B, Cin, H, W = 2, 4, 16, 16
    Cout, E = 128, 32
    kh = kw = 3

    ks = jax.random.split(key, 8)
    image = jax.random.normal(ks[0], (B, Cin, H, W), jnp.float32)
    params = dict(
        w_conv=0.1 * jax.random.normal(ks[1], (Cout, Cin, kh, kw), jnp.float32),
        bn_gamma=1.0 + 0.1 * jax.random.normal(ks[2], (Cout,), jnp.float32),
        bn_beta=0.1 * jax.random.normal(ks[3], (Cout,), jnp.float32),
        bn_mean=0.1 * jax.random.normal(ks[4], (Cout,), jnp.float32),
        bn_var=jax.random.uniform(ks[5], (Cout,), jnp.float32, 0.5, 1.5),
        w_fc=0.1 * jax.random.normal(ks[6], (E, Cout), jnp.float32),
        b_fc=0.1 * jax.random.normal(ks[7], (E,), jnp.float32),
    )

    out = jax.block_until_ready(jax.jit(encoder_cnn_forward)(image, params))
    ref = jax.block_until_ready(encoder_cnn_reference(image, params))

    assert out.shape == (B, E), out.shape
    np.testing.assert_allclose(np.asarray(out), np.asarray(ref),
                               rtol=5e-2, atol=5e-2)
    print("KERNEL_OK")
</pallas_src>

<mosaic_0001>
module attributes {stable_mosaic.version = 11 : i64} {
  func.func @_conv_pool_fc_kernel(%arg0: i32, %arg1: i32, %arg2: i32, %arg3: memref<1x256x48xbf16, #tpu.memory_space<vmem>>, %arg4: memref<48x128xbf16, #tpu.memory_space<vmem>>, %arg5: memref<1x128xf32, #tpu.memory_space<vmem>>, %arg6: memref<128x32xf32, #tpu.memory_space<vmem>>, %arg7: memref<1x1x1x32xf32, #tpu.memory_space<vmem>>, %arg8: memref<1x128xf32, #tpu.memory_space<vmem>>) attributes {dimension_semantics = [#tpu.dimension_semantics<parallel>, #tpu.dimension_semantics<parallel>, #tpu.dimension_semantics<arbitrary>], iteration_bounds = array<i64: 2, 2, 1>, scalar_prefetch = 0 : i64, scratch_operands = 1 : i64, tpu.core_type = #tpu.core_type<tc>, window_params = [{transform_indices = @transform_0, window_bounds = array<i64: 1, 256, 48>}, {pipeline_mode = #tpu.pipeline_mode<synchronous>, transform_indices = @transform_1, window_bounds = array<i64: 48, 128>}, {pipeline_mode = #tpu.pipeline_mode<synchronous>, transform_indices = @transform_2, window_bounds = array<i64: 1, 128>}, {pipeline_mode = #tpu.pipeline_mode<synchronous>, transform_indices = @transform_3, window_bounds = array<i64: 128, 32>}, {transform_indices = @transform_4, window_bounds = array<i64: 1, 1, 1, 32>}]} {
    %c0_i32 = arith.constant 0 : i32
    %0 = arith.cmpi eq, %arg2, %c0_i32 : i32
    %1 = arith.extui %0 : i1 to i32
    %c0_i32_0 = arith.constant 0 : i32
    %2 = arith.cmpi ne, %1, %c0_i32_0 : i32
    scf.if %2 {
      %cst_15 = arith.constant 0.000000e+00 : f32
      %20 = vector.broadcast %cst_15 : f32 to vector<1x128xf32>
      %c0_16 = arith.constant 0 : index
      %c0_17 = arith.constant 0 : index
      %21 = vector.load %arg8[%c0_16, %c0_17] : memref<1x128xf32, #tpu.memory_space<vmem>>, vector<1x128xf32>
      tpu.vector_store %arg8[%c0_16, %c0_17], %20 {strides = array<i32>} : memref<1x128xf32, #tpu.memory_space<vmem>>, vector<1x128xf32>,
    } else {
    }
    %c0 = arith.constant 0 : index
    %c0_1 = arith.constant 0 : index
    %c0_2 = arith.constant 0 : index
    %3 = vector.load %arg3[%c0, %c0_1, %c0_2] : memref<1x256x48xbf16, #tpu.memory_space<vmem>>, vector<1x256x48xbf16>
    %4 = vector.shape_cast %3 : vector<1x256x48xbf16> to vector<256x48xbf16>
    %c0_3 = arith.constant 0 : index
    %c0_4 = arith.constant 0 : index
    %5 = vector.load %arg4[%c0_3, %c0_4] : memref<48x128xbf16, #tpu.memory_space<vmem>>, vector<48x128xbf16>
    %cst = arith.constant dense<0.000000e+00> : vector<256x128xf32>
    %6 = tpu.matmul %4, %5, %cst {dimension_numbers = #tpu.dot_dimension_numbers<[1], [0], [0], [1], [0, 0, 1, 1], [], []>} : vector<256x48xbf16>, vector<48x128xbf16>, vector<256x128xf32> -> vector<256x128xf32>
    %c0_5 = arith.constant 0 : index
    %c0_6 = arith.constant 0 : index
    %7 = vector.load %arg5[%c0_5, %c0_6] : memref<1x128xf32, #tpu.memory_space<vmem>>, vector<1x128xf32>
    %8 = vector.broadcast %7 : vector<1x128xf32> to vector<256x128xf32>
    %9 = arith.addf %6, %8 : vector<256x128xf32>
    %cst_7 = arith.constant 0.000000e+00 : f32
    %10 = vector.broadcast %cst_7 : f32 to vector<256x128xf32>
    %11 = arith.maximumf %9, %10 : vector<256x128xf32>
    %c0_8 = arith.constant 0 : index
    %c0_9 = arith.constant 0 : index
    %12 = vector.load %arg8[%c0_8, %c0_9] : memref<1x128xf32, #tpu.memory_space<vmem>>, vector<1x128xf32>
    %cst_10 = arith.constant dense<0.000000e+00> : vector<128xf32>
    %13 = vector.multi_reduction <add>, %11, %cst_10 [0] : vector<256x128xf32> to vector<128xf32>
    %14 = vector.shape_cast %13 : vector<128xf32> to vector<1x128xf32>
    %15 = arith.addf %12, %14 : vector<1x128xf32>
    %c0_11 = arith.constant 0 : index
    %c0_12 = arith.constant 0 : index
    %16 = vector.load %arg8[%c0_11, %c0_12] : memref<1x128xf32, #tpu.memory_space<vmem>>, vector<1x128xf32>
    tpu.vector_store %arg8[%c0_11, %c0_12], %15 {strides = array<i32>} : memref<1x128xf32, #tpu.memory_space<vmem>>, vector<1x128xf32>,
    %c0_i32_13 = arith.constant 0 : i32
    %17 = arith.cmpi eq, %arg2, %c0_i32_13 : i32
    %18 = arith.extui %17 : i1 to i32
    %c0_i32_14 = arith.constant 0 : i32
    %19 = arith.cmpi ne, %18, %c0_i32_14 : i32
    scf.if %19 {
      %c256_i32 = arith.constant 256 : i32
      %20 = arith.muli %arg1, %c256_i32 : i32
      %c49_i32 = arith.constant 49 : i32
      %21 = arith.subi %c49_i32, %20 : i32
      %c0_i32_15 = arith.constant 0 : i32
      %c256_i32_16 = arith.constant 256 : i32
      %22 = arith.maxsi %c0_i32_15, %21 : i32
      %23 = arith.minsi %c256_i32_16, %22 : i32
      %c256_i32_17 = arith.constant 256 : i32
      %24 = arith.subi %c256_i32_17, %23 : i32
      %25 = arith.sitofp %24 : i32 to f32
      %c0_18 = arith.constant 0 : index
      %c0_19 = arith.constant 0 : index
      %26 = vector.load %arg8[%c0_18, %c0_19] : memref<1x128xf32, #tpu.memory_space<vmem>>, vector<1x128xf32>
      %c0_20 = arith.constant 0 : index
      %c0_21 = arith.constant 0 : index
      %27 = vector.load %arg5[%c0_20, %c0_21] : memref<1x128xf32, #tpu.memory_space<vmem>>, vector<1x128xf32>
      %cst_22 = arith.constant 0.000000e+00 : f32
      %28 = vector.broadcast %cst_22 : f32 to vector<1x128xf32>
      %29 = arith.maximumf %27, %28 : vector<1x128xf32>
      %30 = vector.broadcast %25 : f32 to vector<1x128xf32>
      %31 = arith.mulf %30, %29 : vector<1x128xf32>
      %32 = arith.subf %26, %31 : vector<1x128xf32>
      %cst_23 = arith.constant 0.0204081628 : f32
      %33 = vector.broadcast %cst_23 : f32 to vector<1x128xf32>
      %34 = arith.mulf %32, %33 : vector<1x128xf32>
      %c0_24 = arith.constant 0 : index
      %c0_25 = arith.constant 0 : index
      %35 = vector.load %arg6[%c0_24, %c0_25] : memref<128x32xf32, #tpu.memory_space<vmem>>, vector<128x32xf32>
      %cst_26 = arith.constant dense<0.000000e+00> : vector<1x32xf32>
      %36 = tpu.matmul %34, %35, %cst_26 {dimension_numbers = #tpu.dot_dimension_numbers<[1], [0], [0], [1], [0, 0, 1, 1], [], []>} : vector<1x128xf32>, vector<128x32xf32>, vector<1x32xf32> -> vector<1x32xf32>
      %37 = vector.shape_cast %36 : vector<1x32xf32> to vector<1x1x1x32xf32>
      %c0_27 = arith.constant 0 : index
      %c0_28 = arith.constant 0 : index
      %c0_29 = arith.constant 0 : index
      %c0_30 = arith.constant 0 : index
      %38 = vector.load %arg7[%c0_27, %c0_28, %c0_29, %c0_30] : memref<1x1x1x32xf32, #tpu.memory_space<vmem>>, vector<1x1x1x32xf32>
      tpu.vector_store %arg7[%c0_27, %c0_28, %c0_29, %c0_30], %37 {strides = array<i32>} : memref<1x1x1x32xf32, #tpu.memory_space<vmem>>, vector<1x1x1x32xf32>,
    } else {
    }
    return
  }
  func.func @transform_0(%arg0: i32, %arg1: i32, %arg2: i32) -> (i32, i32, i32) {
    %c1_i32 = arith.constant 1 : i32
    %0 = arith.muli %arg1, %c1_i32 : i32
    %1 = arith.addi %0, %arg2 : i32
    %c0_i32 = arith.constant 0 : i32
    %c0_i32_0 = arith.constant 0 : i32
    return %arg0, %1, %c0_i32 : i32, i32, i32
  }
  func.func @transform_1(%arg0: i32, %arg1: i32, %arg2: i32) -> (i32, i32) {
    %c0_i32 = arith.constant 0 : i32
    %c0_i32_0 = arith.constant 0 : i32
    %c0_i32_1 = arith.constant 0 : i32
    return %c0_i32, %c0_i32_0 : i32, i32
  }
  func.func @transform_2(%arg0: i32, %arg1: i32, %arg2: i32) -> (i32, i32) {
    %c0_i32 = arith.constant 0 : i32
    %c0_i32_0 = arith.constant 0 : i32
    %c0_i32_1 = arith.constant 0 : i32
    return %c0_i32, %c0_i32_0 : i32, i32
  }
  func.func @transform_3(%arg0: i32, %arg1: i32, %arg2: i32) -> (i32, i32) {
    %c0_i32 = arith.constant 0 : i32
    %c0_i32_0 = arith.constant 0 : i32
    %c0_i32_1 = arith.constant 0 : i32
    return %c0_i32, %c0_i32_0 : i32, i32
  }
  func.func @transform_4(%arg0: i32, %arg1: i32, %arg2: i32) -> (i32, i32, i32, i32) {
    %c0_i32 = arith.constant 0 : i32
    %c0_i32_0 = arith.constant 0 : i32
    %c0_i32_1 = arith.constant 0 : i32
    return %arg0, %arg1, %c0_i32, %c0_i32_0 : i32, i32, i32, i32
  }
}

</mosaic_0001>

<bundles_post_ra>
// kernel: encoder_cnn_forward.1
= control target key start
LH: loop header
LB: loop body
LE: loop exit
PB: predicated region body
PF: predicated region fallthrough
CT: control target
= control target key end

     0   :  { %s1190_s15 = smov 0   ;;  %s1192_s16 = smov 0   ;;  %s1394_s0 = inlined_call_operand.vmem [shape: bf16[2,512,48], index: 0, kind: input, shape index: {}]   ;;  %s1395_s1 = inlined_call_operand.vmem [shape: bf16[48,128], index: 1, kind: input, shape index: {}]   ;;  %s1396_s2 = inlined_call_operand.vmem [shape: f32[1,128], index: 2, kind: input, shape index: {}]   ;;  %s1397_s3 = inlined_call_operand.vmem [shape: f32[128,32], index: 3, kind: input, shape index: {}]   ;;  %s1398_s4 = inlined_call_operand.vmem [shape: f32[2,2,1,32], index: 4, kind: output, shape index: {}]  }
   0x1   :  { %s1194_s17 = smov 0   ;;  %s1196_s18 = smov 0  }
   0x2   :  { %s1198_s19 = smov 0  }
   0x3 LB: > { %s29_s20 = sadd.s32 1, %s1152_s17  ;;  %s33_s21 = sadd.s32 1, %s1156_s18  ;;  %s1160_s19 = sphi %s1198_s19, %s14_s19   ;;  %s1156_s18 = sphi %s1196_s18, %s1402_s18   ;;  %s1152_s17 = sphi %s1194_s17, %s1401_s17   ;;  %s1148_s16 = sphi %s1192_s16, %s1400_s16   ;;  %s1144_s15 = sphi %s1190_s15, %s1399_s15  }
   0x4   : > { %p31_p0 = scmp.ge.s32.totalorder %s29_s20, 2  ;;  %p870_p1 = scmp.ge.s32.totalorder %s1160_s19, 1 }
   0x5   : > { %p194_p2 = scmp.lt.s32.totalorder %s1160_s19, 5 }
   0x6   : > { %s1404_s20 = smov (%p31_p0, %s29_s20), 0  ;;  %s1406_s21 = smov (!%p31_p0, %s33_s21), %s1156_s18 }
   0x7   : > { %p195_p3 = pnand %p870_p1, %p194_p2  ;;  %p35_p4 = scmp.ge.s32.totalorder %s1406_s21, 2 }
   0x8   : > { %v1103_v0 = vld [vmem:[%s1395_s1] sm:$0xff] (!%p195_p3)   ;;  %s871_s24 = sshll.u32 (!%p195_p3), %s1144_s15, 5  ;;  %v1104_v1 = vld [vmem:[%s1395_s1 + $0x8] sm:$0xff] (!%p195_p3)   ;;  %p229_p5 = scmp.lt.s32.totalorder (!%p195_p3), %s1148_s16, 1  ;;  %v1105_v2 = vld [vmem:[%s1395_s1 + $0x10] sm:$0xff] (!%p195_p3)   ;;  %vm395_vm0 = vcmask (!%p195_p3), 392192  }
   0x9   : > { %s1408_s21 = smov (%p35_p4, %s1406_s21), 0  ;;  %198 = sbr.rel (%p195_p3) target bundleno = 543 (0x21f), region = 36 }
   0xa   : > { %957 = vmatprep.subr.bf16.mxu0 (!%p195_p3), %v1103_v0  ;;  %p231_p6 = scmp.lt.s32.totalorder (!%p195_p3), %s871_s24, 63  ;;  %1054 = vmatprep.subr.bf16.mxu1 (!%p195_p3), %v1103_v0  ;;  %v695_v19 = vld [vmem:[%s1397_s3] sm:$0xff] (!%p195_p3)  ;;  %v696_v20 = vld [vmem:[%s1397_s3 + $0x8] sm:$0xff] (!%p195_p3)  ;;  %v1162_v22 = vmov (!%p195_p3), 0.0|0.0   ;;  %v697_v23 = vld [vmem:[%s1397_s3 + $0x10] sm:$0xff] (!%p195_p3)  ;;  %v1163_v31 = vmov (!%p195_p3), 0.0  }
   0xb   : > { %958 = vmatpush3.bf16.msra.mxu0 (!%p195_p3), %v1103_v0  ;;  %1057 = vmatpush3.bf16.msra.mxu1 (!%p195_p3), %v1103_v0  ;;  %v1031_v21 = vpack.c.bf16 (!%p195_p3), %v696_v20, %v695_v19  ;;  %v698_v24 = vld [vmem:[%s1397_s3 + $0x18] sm:$0xff] (!%p195_p3)  ;;  %v699_v26 = vld [vmem:[%s1397_s3 + $0x20] sm:$0xff] (!%p195_p3)  ;;  %v700_v27 = vld [vmem:[%s1397_s3 + $0x28] sm:$0xff] (!%p195_p3)  ;;  %251 = vst [vmem:[#allocation2] sm:$0x1] (!%p195_p3), %v1163_v31  ;;  %vm1164_vm1 = vmmov (!%p195_p3), 0  }
   0xc   : > { %959 = vmatprep.subr.bf16.mxu0 (!%p195_p3), %v1104_v1  ;;  %1055 = vmatprep.subr.bf16.mxu1 (!%p195_p3), %v1104_v1  ;;  %v1034_v25 = vpack.c.bf16 (!%p195_p3), %v698_v24, %v697_v23  ;;  %v1037_v28 = vpack.c.bf16 (!%p195_p3), %v700_v27, %v699_v26  ;;  %v701_v29 = vld [vmem:[%s1397_s3 + $0x30] sm:$0xff] (!%p195_p3)  ;;  %v702_v30 = vld [vmem:[%s1397_s3 + $0x38] sm:$0xff] (!%p195_p3)  ;;  %v703_v33 = vld [vmem:[%s1397_s3 + $0x40] sm:$0xff] (!%p195_p3)  ;;  %p241_p9 = scmp.lt.s32.totalorder (!%p195_p3), %s1144_s15, 1  ;;  %vm781_vm2 = vcmask (!%p195_p3), 253952  }
   0xd   : > { %v1040_v32 = vpack.c.bf16 (!%p195_p3), %v702_v30, %v701_v29  ;;  %v704_v34 = vld [vmem:[%s1397_s3 + $0x48] sm:$0xff] (!%p195_p3)  ;;  %v705_v35 = vld [vmem:[%s1397_s3 + $0x50] sm:$0xff] (!%p195_p3)  ;;  %v706_v37 = vld [vmem:[%s1397_s3 + $0x58] sm:$0xff] (!%p195_p3) }
   0xe   : > { %v1043_v36 = vpack.c.bf16 (!%p195_p3), %v704_v34, %v703_v33  ;;  %v1046_v38 = vpack.c.bf16 (!%p195_p3), %v706_v37, %v705_v35  ;;  %v707_v39 = vld [vmem:[%s1397_s3 + $0x60] sm:$0xff] (!%p195_p3)  ;;  %v708_v40 = vld [vmem:[%s1397_s3 + $0x68] sm:$0xff] (!%p195_p3)  ;;  %v709_v42 = vld [vmem:[%s1397_s3 + $0x70] sm:$0xff] (!%p195_p3) }
   0xf   : > { %960 = vmatpush3.bf16.msra.mxu0 (!%p195_p3), %v1104_v1  ;;  %1058 = vmatpush3.bf16.msra.mxu1 (!%p195_p3), %v1104_v1  ;;  %v1049_v41 = vpack.c.bf16 (!%p195_p3), %v708_v40, %v707_v39  ;;  %v710_v43 = vld [vmem:[%s1397_s3 + $0x78] sm:$0xff] (!%p195_p3)  ;;  %v1323_v45 = vld [vmem:[%s1396_s2] ss:$0 sm:$0xff] (!%p195_p3) }
  0x10   : > { %s1410_s16 = smov (!%p229_p5, %s1148_s16), 1  ;;  %s1412_s24 = smov (!%p231_p6, %s871_s24), 63  ;;  %961 = vmatprep.subr.bf16.mxu0 %v1105_v2  ;;  %1056 = vmatprep.subr.bf16.mxu1 %v1105_v2  ;;  %v1052_v44 = vpack.c.bf16 %v710_v43, %v709_v42 }
  0x11   : > { %s872_s29 = sshll.u32 %s1410_s16, 6  ;;  %s874_s12 = sshll.u32 %s1410_s16, 1 }
  0x12   : > { %s234_s30 = sadd.s32 %s872_s29, %s1412_s24 }
  0x13   : > { %s873_s5 = sshll.u32 %s234_s30, 2  ;;  %962 = vmatpush3.bf16.msra.mxu0 %v1105_v2  ;;  %1059 = vmatpush3.bf16.msra.mxu1 %v1105_v2 }
  0x14   : > { %s1238_s8 = scalar_lea.vmem %s1394_s0, %s873_s5  ;;  %1030 = vmatprep.subr.bf16.mxu1 %v1162_v22  ;;  %s911_s5 = sshll.u32 %s1144_s15, 8 }
  0x15   : > { %v1106_v3 = vld [vmem:[%s1238_s8] sm:$0xff]   ;;  %v1107_v4 = vld [vmem:[%s1238_s8 + $0x8] sm:$0xff]   ;;  %v1108_v5 = vld [vmem:[%s1238_s8 + $0x10] sm:$0xff]   ;;  %s681_s6 = ssub.s32 49, %s911_s5  ;;  %s1416_s15 = smov (!%p241_p9, %s1144_s15), 1 }
  0x16   : > { %963 = vmatprep.mubr.msk.bf16.mxu0 %vm395_vm0, %v1106_v3  ;;  %v1109_v6 = vld [vmem:[%s1238_s8 + $0x18] sm:$0xff]   ;;  %v1110_v7 = vld [vmem:[%s1238_s8 + $0x20] sm:$0xff]   ;;  %v1115_v9 = vld [vmem:[%s1238_s8 + $0x48] sm:$0xff]   ;;  %p682_p7 = scmp.gt.s32.totalorder %s681_s6, 0  ;;  %p912_p8 = scmp.lt.s32.totalorder %s681_s6, 256 }
  0x17   : > { %964 = vmatmul.mubr.msk.bf16.vlgmr.msra.gmra.mrb[0].mxu0 %vm395_vm0, %v1107_v4  ;;  %v1114_v8 = vld [vmem:[%s1238_s8 + $0x40] sm:$0xff]   ;;  %v1116_v10 = vld [vmem:[%s1238_s8 + $0x50] sm:$0xff]   ;;  %v1117_v11 = vld [vmem:[%s1238_s8 + $0x58] sm:$0xff]   ;;  %s244_s13 = sadd.s32 %s874_s12, %s1416_s15 }
  0x18   : > { %967 = vmatprep.mubr.msk.bf16.mxu0 %vm395_vm0, %v1108_v5  ;;  %979 = vmatprep.mubr.msk.bf16.mxu1 %vm395_vm0, %v1114_v8  ;;  %v1118_v12 = vld [vmem:[%s1238_s8 + $0x60] sm:$0xff]   ;;  %v1111_v13 = vld [vmem:[%s1238_s8 + $0x28] sm:$0xff]   ;;  %v1112_v14 = vld [vmem:[%s1238_s8 + $0x30] sm:$0xff]   ;;  %s683_s7 = scalar_select %p682_p7, %s681_s6, 0 }
  0x19   : > { %980 = vmatmul.mubr.msk.bf16.vlgmr.msra.gmra.mrb[0].mxu1 %vm395_vm0, %v1115_v9  ;;  %v1119_v15 = vld [vmem:[%s1238_s8 + $0x68] sm:$0xff]   ;;  %v1120_v16 = vld [vmem:[%s1238_s8 + $0x70] sm:$0xff]   ;;  %v1113_v17 = vld [vmem:[%s1238_s8 + $0x38] sm:$0xff]   ;;  %s245_s23 = scalar_lea.vmem %s1398_s4, %s244_s13 }
  0x1a   : > { %983 = vmatprep.mubr.msk.bf16.mxu1 %vm395_vm0, %v1116_v10  ;;  %v1121_v18 = vld [vmem:[%s1238_s8 + $0x78] sm:$0xff]   ;;  %1032 = vmatpush3.bf16.msra.mxu1 %v1031_v21  ;;  %s1414_s7 = smov (!%p912_p8, %s683_s7), 256 }
  0x1b   : > { %1033 = vmatprep.subr.bf16.mxu1 %v1162_v22  ;;  %s686_s8 = ssub.s32 256, %s1414_s7 }
  0x1c   : > { %s687_s9 = scvt.s32.f32 %s686_s8 }
  0x1e   : > { %1035 = vmatpush3.bf16.msra.mxu1 %v1034_v25 }
  0x1f   : > { %968 = vmatmul.mubr.msk.bf16.gmra.mrb[4].mxu0 %vm395_vm0, %v1109_v6  ;;  %1036 = vmatprep.subr.bf16.mxu1 %v1162_v22 }
  0x20   : > { %971 = vmatprep.mubr.msk.bf16.mxu0 %vm395_vm0, %v1110_v7 }
  0x21   : > { %984 = vmatmul.mubr.msk.bf16.gmra.mrb[4].mxu1 %vm395_vm0, %v1117_v11 }
  0x22   : > { %987 = vmatprep.mubr.msk.bf16.mxu1 %vm395_vm0, %v1118_v12  ;;  %1038 = vmatpush3.bf16.msra.mxu1 %v1037_v28 }
  0x23   : > { %1039 = vmatprep.subr.bf16.mxu1 %v1162_v22 }
  0x26   : > { %1041 = vmatpush3.bf16.msra.mxu1 %v1040_v32 }
  0x27   : > { %972 = vmatmul.mubr.msk.bf16.gmra.mrb[8].mxu0 %vm395_vm0, %v1111_v13  ;;  %1042 = vmatprep.subr.bf16.mxu1 %v1162_v22 }
  0x28   : > { %975 = vmatprep.mubr.msk.bf16.mxu0 %vm395_vm0, %v1112_v14 }
  0x29   : > { %988 = vmatmul.mubr.msk.bf16.gmra.mrb[8].mxu1 %vm395_vm0, %v1119_v15 }
  0x2a   : > { %991 = vmatprep.mubr.msk.bf16.mxu1 %vm395_vm0, %v1120_v16  ;;  %1044 = vmatpush3.bf16.msra.mxu1 %v1043_v36 }
  0x2b   : > { %1045 = vmatprep.subr.bf16.mxu1 %v1162_v22 }
  0x2e   : > { %1047 = vmatpush3.bf16.msra.mxu1 %v1046_v38 }
  0x2f   : > { %976 = vmatmul.mubr.msk.bf16.gmra.mrb[12].mxu0 %vm395_vm0, %v1113_v17  ;;  %1048 = vmatprep.subr.bf16.mxu1 %v1162_v22 }
  0x31   : > { %992 = vmatmul.mubr.msk.bf16.gmra.mrb[12].mxu1 %vm395_vm0, %v1121_v18 }
  0x32   : > { %1027 = vmatprep.mubr.msk.f32.mxu1 %vm1164_vm1, %v1163_v31  ;;  %1050 = vmatpush3.bf16.msra.mxu1 %v1049_v41 }
  0x33   : > { %1051 = vmatprep.subr.bf16.mxu1 %v1162_v22 }
  0x36   : > { %1053 = vmatpush3.bf16.msra.mxu1 %v1052_v44 }
  0xea   : > { %v965_v46 = vpop.f32.mrb[0].mxu0 }
  0xeb   : > { %v478_v47 = vpop.f32.mrb[1].mxu0  ;;  %v487_v51 = vadd.f32 %v965_v46, %v1323_v45 }
  0xec   : > { %v479_v48 = vadd.f32 %v1323_v45, %v478_v47  ;;  %v966_v49 = vpop.f32.mrb[2].mxu0  ;;  %v1329_v56 = vpop.f32.mrb[0].mxu1 }
  0xed   : > { %v481_v50 = vpop.f32.mrb[3].mxu0  ;;  %v490_v54 = vadd.f32 %v966_v49, %v1323_v45  ;;  %v542_v57 = vpop.f32.mrb[1].mxu1  ;;  %v607_v58 = vmax.f32 %v487_v51, 0.0 }
  0xee   : > { %v482_v52 = vadd.f32 %v1323_v45, %v481_v50  ;;  %v605_v53 = vmax.f32 %v479_v48, 0.0  ;;  %v1331_v61 = vpop.f32.mrb[2].mxu1 }
  0xef   : > { %v1333_v63 = vpop.f32.mrb[3].mxu1  ;;  %v608_v0 = vmax.f32 %v490_v54, 0.0 }
  0xf0   : > { %v606_v55 = vmax.f32 %v482_v52, 0.0 }
  0xf2   : > { %v638_v59 = vadd.f32 %v606_v55, %v605_v53  ;;  %v969_v60 = vpop.f32.mrb[4].mxu0  ;;  %v543_v53 = vadd.f32 %v1323_v45, %v542_v57  ;;  %v554_v57 = vadd.f32 %v1331_v61, %v1323_v45 }
  0xf3   : > { %v494_v62 = vpop.f32.mrb[5].mxu0  ;;  %v503_v5 = vadd.f32 %v969_v60, %v1323_v45 }
  0xf4   : > { %v639_v1 = vadd.f32 %v638_v59, %v607_v58  ;;  %v495_v2 = vadd.f32 %v1323_v45, %v494_v62  ;;  %v970_v3 = vpop.f32.mrb[6].mxu0  ;;  %v1339_v12 = vpop.f32.mrb[4].mxu1 }
  0xf5   : > { %v497_v4 = vpop.f32.mrb[7].mxu0  ;;  %v506_v10 = vadd.f32 %v970_v3, %v1323_v45  ;;  %v558_v13 = vpop.f32.mrb[5].mxu1  ;;  %v611_v14 = vmax.f32 %v503_v5, 0.0  ;;  %v546_v3 = vadd.f32 %v1323_v45, %v1333_v63  ;;  %v567_v63 = vadd.f32 %v1339_v12, %v1323_v45 }
  0xf6   : > { %v609_v6 = vmax.f32 %v495_v2, 0.0  ;;  %v640_v7 = vadd.f32 %v639_v1, %v608_v0  ;;  %v498_v8 = vadd.f32 %v1323_v45, %v497_v4  ;;  %v986_v17 = vpop.f32.mrb[6].mxu1  ;;  %v621_v2 = vmax.f32 %v543_v53, 0.0  ;;  %v689_v53 = vld [vmem:[%s1396_s2] sm:$0x1] }
  0xf7   : > { %v561_v19 = vpop.f32.mrb[7].mxu1  ;;  %v612_v20 = vmax.f32 %v506_v10, 0.0  ;;  %v551_v4 = vadd.f32 %v1329_v56, %v1323_v45 }
  0xf8   : > { %v641_v9 = vadd.f32 %v640_v7, %v609_v6  ;;  %v610_v11 = vmax.f32 %v498_v8, 0.0  ;;  %v622_v7 = vmax.f32 %v546_v3, 0.0  ;;  %v559_v8 = vadd.f32 %v1323_v45, %v558_v13 }
  0xfa   : > { %v642_v15 = vadd.f32 %v641_v9, %v610_v11  ;;  %v973_v16 = vpop.f32.mrb[8].mxu0  ;;  %v623_v9 = vmax.f32 %v551_v4, 0.0  ;;  %v624_v11 = vmax.f32 %v554_v57, 0.0 }
  0xfb   : > { %v510_v18 = vpop.f32.mrb[9].mxu0  ;;  %v519_v25 = vadd.f32 %v973_v16, %v1323_v45  ;;  %v562_v16 = vadd.f32 %v1323_v45, %v561_v19 }
  0xfc   : > { %v643_v21 = vadd.f32 %v642_v15, %v611_v14  ;;  %v511_v22 = vadd.f32 %v1323_v45, %v510_v18  ;;  %v974_v23 = vpop.f32.mrb[10].mxu0  ;;  %v989_v32 = vpop.f32.mrb[8].mxu1  ;;  %v625_v15 = vmax.f32 %v559_v8, 0.0 }
  0xfd   : > { %v513_v24 = vpop.f32.mrb[11].mxu0  ;;  %v522_v30 = vadd.f32 %v974_v23, %v1323_v45  ;;  %v574_v33 = vpop.f32.mrb[9].mxu1  ;;  %v615_v34 = vmax.f32 %v519_v25, 0.0  ;;  %v583_v19 = vadd.f32 %v989_v32, %v1323_v45 }
  0xfe   : > { %v613_v26 = vmax.f32 %v511_v22, 0.0  ;;  %v644_v27 = vadd.f32 %v643_v21, %v612_v20  ;;  %v514_v28 = vadd.f32 %v1323_v45, %v513_v24  ;;  %v990_v37 = vpop.f32.mrb[10].mxu1  ;;  %v570_v20 = vadd.f32 %v986_v17, %v1323_v45 }
  0xff   : > { %v577_v39 = vpop.f32.mrb[11].mxu1  ;;  %v616_v40 = vmax.f32 %v522_v30, 0.0  ;;  %v626_v21 = vmax.f32 %v562_v16, 0.0  ;;  %v575_v61 = vadd.f32 %v1323_v45, %v574_v33  ;;  %v627_v22 = vmax.f32 %v567_v63, 0.0 }
 0x100   : > { %v645_v29 = vadd.f32 %v644_v27, %v613_v26  ;;  %v614_v31 = vmax.f32 %v514_v28, 0.0  ;;  %v628_v13 = vmax.f32 %v570_v20, 0.0  ;;  %v578_v26 = vadd.f32 %v1323_v45, %v577_v39 }
 0x101   : > { %v629_v25 = vmax.f32 %v575_v61, 0.0  ;;  %v586_v12 = vadd.f32 %v990_v37, %v1323_v45  ;;  %v631_v30 = vmax.f32 %v583_v19, 0.0 }
 0x102   : > { %v646_v35 = vadd.f32 %v645_v29, %v614_v31  ;;  %v977_v36 = vpop.f32.mrb[12].mxu0  ;;  %v630_v29 = vmax.f32 %v578_v26, 0.0 }
 0x103   : > { %v526_v38 = vpop.f32.mrb[13].mxu0  ;;  %v535_v46 = vadd.f32 %v977_v36, %v1323_v45  ;;  %v632_v33 = vmax.f32 %v586_v12, 0.0 }
 0x104   : > { %v647_v41 = vadd.f32 %v646_v35, %v615_v34  ;;  %v527_v42 = vadd.f32 %v1323_v45, %v526_v38  ;;  %v978_v43 = vpop.f32.mrb[14].mxu0  ;;  %v993_v54 = vpop.f32.mrb[12].mxu1 }
 0x105   : > { %v529_v44 = vpop.f32.mrb[15].mxu0  ;;  %v538_v51 = vadd.f32 %v978_v43, %v1323_v45  ;;  %v590_v55 = vpop.f32.mrb[13].mxu1  ;;  %v619_v58 = vmax.f32 %v535_v46, 0.0  ;;  %v599_v38 = vadd.f32 %v993_v54, %v1323_v45 }
 0x106   : > { %v617_v47 = vmax.f32 %v527_v42, 0.0  ;;  %v648_v48 = vadd.f32 %v647_v41, %v616_v40  ;;  %v530_v49 = vadd.f32 %v1323_v45, %v529_v44  ;;  %v994_v60 = vpop.f32.mrb[14].mxu1  ;;  %v591_v17 = vadd.f32 %v1323_v45, %v590_v55 }
 0x107   : > { %v593_v62 = vpop.f32.mrb[15].mxu1  ;;  %v620_v0 = vmax.f32 %v538_v51, 0.0  ;;  %v602_v32 = vadd.f32 %v994_v60, %v1323_v45  ;;  %v635_v37 = vmax.f32 %v599_v38, 0.0  ;;  %v690_v55 = vmax.f32 %v689_v53, 0.0 }
 0x108   : > { %v649_v50 = vadd.f32 %v648_v48, %v617_v47  ;;  %v618_v52 = vmax.f32 %v530_v49, 0.0  ;;  %v633_v35 = vmax.f32 %v591_v17, 0.0  ;;  %v594_v36 = vadd.f32 %v1323_v45, %v593_v62  ;;  %v637_v45 = vld [vmem:[#allocation2] sm:$0x1] }
 0x109   : > { %v636_v43 = vmax.f32 %v602_v32, 0.0 }
 0x10a   : > { %v650_v59 = vadd.f32 %v649_v50, %v618_v52  ;;  %v634_v41 = vmax.f32 %v594_v36, 0.0 }
 0x10c   : > { %v651_v1 = vadd.f32 %v650_v59, %v619_v58  ;;  %v691_v58 = vstv %s687_s9 }
 0x10d   : > { %v692_v59 = vmul.f32 %v691_v58, %v690_v55 }
 0x10e   : > { %v652_v5 = vadd.f32 %v651_v1, %v620_v0 }
 0x110   : > { %v653_v6 = vadd.f32 %v652_v5, %v621_v2 }
 0x112   : > { %v654_v10 = vadd.f32 %v653_v6, %v622_v7 }
 0x114   : > { %v655_v14 = vadd.f32 %v654_v10, %v623_v9 }
 0x116   : > { %v656_v18 = vadd.f32 %v655_v14, %v624_v11 }
 0x118   : > { %v657_v56 = vadd.f32 %v656_v18, %v625_v15 }
 0x11a   : > { %v658_v23 = vadd.f32 %v657_v56, %v626_v21 }
 0x11c   : > { %v659_v24 = vadd.f32 %v658_v23, %v627_v22 }
 0x11e   : > { %v660_v27 = vadd.f32 %v659_v24, %v628_v13 }
 0x120   : > { %v661_v28 = vadd.f32 %v660_v27, %v629_v25 }
 0x122   : > { %v662_v31 = vadd.f32 %v661_v28, %v630_v29 }
 0x124   : > { %v663_v34 = vadd.f32 %v662_v31, %v631_v30 }
 0x126   : > { %v664_v39 = vadd.f32 %v663_v34, %v632_v33 }
 0x128   : > { %v665_v40 = vadd.f32 %v664_v39, %v633_v35 }
 0x12a   : > { %v666_v42 = vadd.f32 %v665_v40, %v634_v41 }
 0x12c   : > { %v667_v44 = vadd.f32 %v666_v42, %v635_v37 }
 0x12e   : > { %v668_v46 = vadd.f32 %v667_v44, %v636_v43 }
 0x130   : > { %v669_v47 = vrot.slane %v668_v46, 4 }
 0x132   : > { %v670_v48 = vadd.f32 %v669_v47, %v668_v46 }
 0x134   : > { %v671_v49 = vrot.slane %v670_v48, 2 }
 0x136   : > { %v672_v50 = vadd.f32 %v671_v49, %v670_v48 }
 0x138   : > { %v673_v51 = vrot.slane %v672_v50, 1 }
 0x13a   : > { %v674_v52 = vadd.f32 %v673_v51, %v672_v50 }
 0x13c   : > { %v675_v54 = vadd.f32 %v674_v52, %v637_v45 }
 0x13e   : > { %676 = vst [vmem:[#allocation2] sm:$0x1] %v675_v54 }
 0x145   : > { %v688_v60 = vld [vmem:[#allocation2] sm:$0x1] }
 0x146   : > { %v693_v62 = vsub.f32 %v688_v60, %v692_v59 }
 0x148   : > { %v694_v0 = vmul.f32 0.020408163, %v693_v62 }
 0x14a   : > { %1028 = vmatmul.mubr.f32.vlgmr.msra.gmra.mrb[16].mxu1 %v694_v0 }
 0x21d   : > { %v777_v1 = vpop.f32.mrb[16].mxu1 }
 0x21e   : > { %782 = vst.msk [vmem:[%s245_s23] sm:$0x1] %vm781_vm2, %v777_v1  ;;  %v1029_v2 = vpop.f32.mrb[17].mxu1 }
 0x21f PF: > { %s14_s19 = sadd.s32 1, %s1160_s19   ;;  %s1399_s15 = smov %s1152_s17 }
 0x220   : > { %p11_p10 = scmp.ge.s32.totalorder %s14_s19, 6   ;;  %s1400_s16 = smov %s1156_s18 }
 0x221   : > { %s1401_s17 = smov %s1404_s20  ;;  %s1402_s18 = smov %s1408_s21 }
 0x222   :  { %13 = sbr.rel (!%p11_p10) target bundleno = 3 (0x3), region = 74 }

</bundles_post_ra>
